<compile_context>
chip_gen: v6e
topology: v6e:2x2x1
jax: 0.10.0
libtpu: 0.0.40
codegen_flags: <defaults>
</compile_context>

<pallas_src>
from functools import partial

import jax
import jax.numpy as jnp
from jax import lax
from jax.experimental import pallas as pl
from jax.experimental.pallas import tpu as pltpu


def _dice_kernel(p_ref, t_ref, num_ref, den_ref, *, pw, C, Sb, tSb,
                 tiles_per_p, labels_mode, one_hot, needs_mask):
    # p_ref  : (1, C, tSb, 128) logits tile
    # t_ref  : (1, C, tSb, 128) one-hot target tile, or (1, 1, tSb, 128) labels
    # num_ref/den_ref: (1, 1, C, 128) resident accumulators (same block over s)
    p_id = pl.program_id(1)
    s_id = pl.program_id(2)

    @pl.when(s_id == 0)
    def _():
        num_ref[...] = jnp.zeros_like(num_ref)
        den_ref[...] = jnp.zeros_like(den_ref)

    x = p_ref[0].astype(jnp.float32)                       # (C, tSb, 128)

    if needs_mask:
        # Tail tile of the cdiv grid: rows past Sb hold garbage -> sanitize the
        # logits before the softmax and zero the contributions below.
        row0 = (p_id * tiles_per_p + s_id) * tSb
        rows = lax.broadcasted_iota(jnp.int32, (1, tSb, 128), 1) + row0
        valid = rows < Sb                                   # (1, tSb, 128)
        x = jnp.where(valid, x, 0.0)

    if labels_mode:
        lab = t_ref[0, 0]                                   # (tSb, 128) int32
        cls = lax.broadcasted_iota(jnp.int32, (C, tSb, 128), 0)
        y = (lab[None, :, :] == cls).astype(jnp.float32)    # one-hot, built in-VPU
    else:
        y = t_ref[0].astype(jnp.float32)                    # (C, tSb, 128)

    # Numerically stable softmax over the class axis (leading, non-layout axis
    # -> pure VPU max/add across C vreg sets). Exact division: the kernel is
    # HBM-bound, so the divide is hidden filler and matches the reference.
    m = jnp.max(x, axis=0, keepdims=True)
    e = jnp.exp(x - m)
    sm = e / jnp.sum(e, axis=0, keepdims=True)

    # Denominator powers. pw == 2 is a single multiply (no jnp.power lowering);
    # one-hot targets satisfy t^p == t, skipping a block-sized temporary.
    if pw == 2:
        p_pow = sm * sm
    elif isinstance(pw, int) and pw >= 1:
        p_pow = sm
        for _ in range(pw - 1):
            p_pow = p_pow * sm
    else:
        p_pow = sm ** pw                                    # sm > 0, safe

    if one_hot:
        t_pow = y
    elif pw == 2:
        t_pow = y * y
    elif isinstance(pw, int) and pw >= 1:
        t_pow = y
        for _ in range(pw - 1):
            t_pow = t_pow * y
    else:
        t_pow = jnp.where(y > 0, y ** pw, 0.0)              # avoid log(0) NaNs

    num_c = sm * y
    den_c = p_pow + t_pow
    if needs_mask:
        num_c = jnp.where(valid, num_c, 0.0)
        den_c = jnp.where(valid, den_c, 0.0)

    # Partial sums over this tile's sublane (row) axis -> (C, 128); the final
    # 128-lane reduce happens in the wrapper. Accumulate into resident blocks.
    num_ref[0, 0] += jnp.sum(num_c, axis=1)
    den_ref[0, 0] += jnp.sum(den_c, axis=1)


def _vmem_capacity_bytes():
    try:
        return int(pltpu.get_tpu_info().vmem_capacity_bytes)
    except Exception:
        return 64 * 1024 * 1024          # conservative (v7x-sized) fallback


def _dice_sums(predict, target_or_labels, *, pw, labels_mode, assume_one_hot,
               max_block_rows=None):
    N, C = predict.shape[0], predict.shape[1]
    S = 1
    for d in predict.shape[2:]:
        S *= d
    # TODO(synk): pad + extra lane mask for spatial sizes not a multiple of 128.
    assert S % 128 == 0, "spatial size (prod of trailing dims) must be a multiple of 128"
    Sb = S // 128

    p = predict.reshape(N, C, Sb, 128)
    if labels_mode:
        t = target_or_labels.reshape(N, 1, Sb, 128).astype(jnp.int32)
        t_blk_c = 1
    else:
        t = target_or_labels.reshape(N, C, Sb, 128)
        t_blk_c = C

    # Generation-aware block cap: bigger tiles amortize the ~0.35 us per-grid-
    # step overhead on v5e/v6e (128 MiB physical VMEM); stay conservative on
    # v7x (64 MiB per TC). Budget covers 2 inputs x 2 pipeline buffers x block
    # plus ~4 block-sized f32 temporaries materialized by the softmax math.
    vmem_cap = _vmem_capacity_bytes()
    if vmem_cap >= 96 * 1024 * 1024:       # v5e / v6e
        blk_cap_bytes, vmem_limit = 4 << 20, 64 << 20
    else:                                  # v7x
        blk_cap_bytes, vmem_limit = 2 << 20, 48 << 20

    itemsize = jnp.dtype(predict.dtype).itemsize
    cap_rows = max(8, (blk_cap_bytes // (C * 128 * itemsize)) // 8 * 8)
    if max_block_rows is not None:         # test/override hook
        cap_rows = max(8, (max_block_rows // 8) * 8)
    if Sb <= cap_rows:
        tSb = Sb                           # full extent (always a legal block dim)
    else:
        tSb = cap_rows                     # multiple of 8 (< Sb): legal block dim
    num_s = (Sb + tSb - 1) // tSb          # cdiv grid; tail tile masked in-kernel
    needs_mask = (num_s * tSb != Sb)

    # Megacore: with N == 1 the batch axis cannot feed both v7x TensorCores, so
    # split the spatial tiles across a second parallel axis when it divides evenly.
    if N == 1 and num_s >= 2 and num_s % 2 == 0:
        P = 2
    else:
        P = 1
    tiles_per_p = num_s // P

    kernel = partial(
        _dice_kernel, pw=pw, C=C, Sb=Sb, tSb=tSb, tiles_per_p=tiles_per_p,
        labels_mode=labels_mode, one_hot=(labels_mode or assume_one_hot),
        needs_mask=needs_mask)

    num_out, den_out = pl.pallas_call(
        kernel,
        out_shape=(
            jax.ShapeDtypeStruct((N, P, C, 128), jnp.float32),
            jax.ShapeDtypeStruct((N, P, C, 128), jnp.float32),
        ),
        grid=(N, P, tiles_per_p),
        in_specs=[
            pl.BlockSpec((1, C, tSb, 128),
                         lambda n, pp, s: (n, 0, pp * tiles_per_p + s, 0)),
            pl.BlockSpec((1, t_blk_c, tSb, 128),
                         lambda n, pp, s: (n, 0, pp * tiles_per_p + s, 0)),
        ],
        out_specs=(
            pl.BlockSpec((1, 1, C, 128), lambda n, pp, s: (n, pp, 0, 0)),
            pl.BlockSpec((1, 1, C, 128), lambda n, pp, s: (n, pp, 0, 0)),
        ),
        compiler_params=pltpu.CompilerParams(
            dimension_semantics=("parallel", "parallel", "arbitrary"),
            vmem_limit_bytes=vmem_limit,
        ),
    )(p, t)

    num = jnp.sum(num_out, axis=(1, 3))    # (N, C)
    den = jnp.sum(den_out, axis=(1, 3))    # (N, C)
    return num, den


def _finalize(num, den, smooth, weight, ignore_index, C):
    num = num + smooth                     # (N, C)
    den = den + smooth                     # (N, C)
    loss_nc = 1.0 - num / den              # (N, C)
    per_class = jnp.mean(loss_nc, axis=0)  # (C,)  (reduction='mean' over batch)
    if ignore_index is not None:
        per_class = jnp.where(jnp.arange(C) == ignore_index, 0.0, per_class)
    if weight is not None:
        # NOTE: reference PyTorch uses (buggy) self.weights; weight applied here.
        per_class = per_class * jnp.asarray(weight, dtype=per_class.dtype)
    return jnp.sum(per_class) / C


def custom_dice_loss(predict, target, smooth=1.0, pw=2, weight=None,
                     ignore_index=None, assume_one_hot=False,
                     max_block_rows=None):
    """predict, target: [N, C, *spatial] (same shape). Returns scalar f32 loss.

    f32 or bf16 inputs accepted (math is f32 in-kernel); bf16 halves the HBM
    read stream of this memory-bound kernel.
    """
    assert predict.shape == target.shape, "predict & target shape do not match"
    C = predict.shape[1]
    num, den = _dice_sums(predict, target, pw=pw, labels_mode=False,
                          assume_one_hot=assume_one_hot,
                          max_block_rows=max_block_rows)
    return _finalize(num, den, smooth, weight, ignore_index, C)


def custom_dice_loss_from_labels(predict, labels, smooth=1.0, pw=2, weight=None,
                                 ignore_index=None, max_block_rows=None):
    """Fast path: integer class labels [N, *spatial] instead of a one-hot target.

    Equivalent to custom_dice_loss(predict, one_hot(labels)) but reads 4 B/pixel
    of target from HBM instead of 4*C B/pixel; the per-class mask is rebuilt
    in-kernel with a compare (free in this HBM-bound regime).
    """
    C = predict.shape[1]
    assert labels.shape == (predict.shape[0],) + predict.shape[2:]
    num, den = _dice_sums(predict, labels, pw=pw, labels_mode=True,
                          assume_one_hot=True, max_block_rows=max_block_rows)
    return _finalize(num, den, smooth, weight, ignore_index, C)


def _reference(predict, target, smooth=1.0, pw=2):
    # Pure-JAX reference mirroring the PyTorch forward (reduction='mean').
    N, C = predict.shape[0], predict.shape[1]
    sm = jax.nn.softmax(predict.astype(jnp.float32), axis=1)
    tgt = target.astype(jnp.float32)
    total = 0.0
    for i in range(C):
        p = sm[:, i].reshape(N, -1)
        t = tgt[:, i].reshape(N, -1)
        num = jnp.sum(p * t, axis=1) + smooth
        den = jnp.sum(p ** pw + t ** pw, axis=1) + smooth
        total = total + jnp.mean(1.0 - num / den)
    return total / C


if __name__ == "__main__":
    key = jax.random.PRNGKey(0)
    k1, k2, k3, k4 = jax.random.split(key, 4)

    # Case 1: one-hot target path, N=2, C=4, 16x16 spatial.
    N, C, H, W = 2, 4, 16, 16
    predict = jax.random.normal(k1, (N, C, H, W), dtype=jnp.float32)
    labels = jax.random.randint(k2, (N, H, W), 0, C)
    target = jax.nn.one_hot(labels, C, dtype=jnp.float32).transpose(0, 3, 1, 2)

    loss1 = jax.block_until_ready(custom_dice_loss(predict, target))
    ref1 = _reference(predict, target)
    assert jnp.allclose(loss1, ref1, atol=1e-5, rtol=1e-5), (loss1, ref1)

    # Case 2: integer-label fast path (same semantics, ~C x less target traffic).
    loss2 = jax.block_until_ready(custom_dice_loss_from_labels(predict, labels))
    assert jnp.allclose(loss2, ref1, atol=1e-5, rtol=1e-5), (loss2, ref1)

    # Case 3: N=1 with Sb=10, forced tSb=8 -> exercises the cdiv grid + tail
    # masking and the 2-way spatial parallel split (megacore path on v7x).
    N2, C2, H2, W2 = 1, 4, 40, 32            # S = 1280 -> Sb = 10
    predict2 = jax.random.normal(k3, (N2, C2, H2, W2), dtype=jnp.float32)
    labels2 = jax.random.randint(k4, (N2, H2, W2), 0, C2)
    target2 = jax.nn.one_hot(labels2, C2, dtype=jnp.float32).transpose(0, 3, 1, 2)

    loss3 = jax.block_until_ready(
        custom_dice_loss(predict2, target2, max_block_rows=8))
    ref3 = _reference(predict2, target2)
    assert jnp.allclose(loss3, ref3, atol=1e-5, rtol=1e-5), (loss3, ref3)

    print("KERNEL_OK")
</pallas_src>

<mosaic_0001>
module attributes {stable_mosaic.version = 11 : i64} {
  func.func @_dice_kernel(%arg0: i32, %arg1: i32, %arg2: i32, %arg3: memref<1x4x2x128xf32, #tpu.memory_space<vmem>>, %arg4: memref<1x4x2x128xf32, #tpu.memory_space<vmem>>, %arg5: memref<1x1x4x128xf32, #tpu.memory_space<vmem>>, %arg6: memref<1x1x4x128xf32, #tpu.memory_space<vmem>>) attributes {dimension_semantics = [#tpu.dimension_semantics<parallel>, #tpu.dimension_semantics<parallel>, #tpu.dimension_semantics<arbitrary>], iteration_bounds = array<i64: 2, 1, 1>, scalar_prefetch = 0 : i64, scratch_operands = 0 : i64, tpu.core_type = #tpu.core_type<tc>, window_params = [{transform_indices = @transform_0, window_bounds = array<i64: 1, 4, 2, 128>}, {transform_indices = @transform_1, window_bounds = array<i64: 1, 4, 2, 128>}, {transform_indices = @transform_2, window_bounds = array<i64: 1, 1, 4, 128>}, {transform_indices = @transform_3, window_bounds = array<i64: 1, 1, 4, 128>}]} {
    %c0_i32 = arith.constant 0 : i32
    %0 = arith.cmpi eq, %arg2, %c0_i32 : i32
    %1 = arith.extui %0 : i1 to i32
    %c0_i32_0 = arith.constant 0 : i32
    %2 = arith.cmpi ne, %1, %c0_i32_0 : i32
    scf.if %2 {
      %cst_27 = arith.constant 0.000000e+00 : f32
      %34 = vector.broadcast %cst_27 : f32 to vector<1x1x4x128xf32>
      %c0_28 = arith.constant 0 : index
      %c0_29 = arith.constant 0 : index
      %c0_30 = arith.constant 0 : index
      %c0_31 = arith.constant 0 : index
      %35 = vector.load %arg5[%c0_28, %c0_29, %c0_30, %c0_31] : memref<1x1x4x128xf32, #tpu.memory_space<vmem>>, vector<1x1x4x128xf32>
      tpu.vector_store %arg5[%c0_28, %c0_29, %c0_30, %c0_31], %34 {strides = array<i32>} : memref<1x1x4x128xf32, #tpu.memory_space<vmem>>, vector<1x1x4x128xf32>,
      %cst_32 = arith.constant 0.000000e+00 : f32
      %36 = vector.broadcast %cst_32 : f32 to vector<1x1x4x128xf32>
      %c0_33 = arith.constant 0 : index
      %c0_34 = arith.constant 0 : index
      %c0_35 = arith.constant 0 : index
      %c0_36 = arith.constant 0 : index
      %37 = vector.load %arg6[%c0_33, %c0_34, %c0_35, %c0_36] : memref<1x1x4x128xf32, #tpu.memory_space<vmem>>, vector<1x1x4x128xf32>
      tpu.vector_store %arg6[%c0_33, %c0_34, %c0_35, %c0_36], %36 {strides = array<i32>} : memref<1x1x4x128xf32, #tpu.memory_space<vmem>>, vector<1x1x4x128xf32>,
    } else {
    }
    %c0 = arith.constant 0 : index
    %c0_1 = arith.constant 0 : index
    %c0_2 = arith.constant 0 : index
    %c0_3 = arith.constant 0 : index
    %3 = vector.load %arg3[%c0, %c0_1, %c0_2, %c0_3] : memref<1x4x2x128xf32, #tpu.memory_space<vmem>>, vector<1x4x2x128xf32>
    %4 = vector.shape_cast %3 : vector<1x4x2x128xf32> to vector<4x2x128xf32>
    %c0_4 = arith.constant 0 : index
    %c0_5 = arith.constant 0 : index
    %c0_6 = arith.constant 0 : index
    %c0_7 = arith.constant 0 : index
    %5 = vector.load %arg4[%c0_4, %c0_5, %c0_6, %c0_7] : memref<1x4x2x128xf32, #tpu.memory_space<vmem>>, vector<1x4x2x128xf32>
    %6 = vector.shape_cast %5 : vector<1x4x2x128xf32> to vector<4x2x128xf32>
    %cst = arith.constant dense<0xFF800000> : vector<2x128xf32>
    %7 = vector.multi_reduction <maximumf>, %4, %cst [0] : vector<4x2x128xf32> to vector<2x128xf32>
    %8 = vector.shape_cast %7 : vector<2x128xf32> to vector<1x2x128xf32>
    %9 = vector.broadcast %8 : vector<1x2x128xf32> to vector<4x2x128xf32>
    %10 = arith.subf %4, %9 : vector<4x2x128xf32>
    %11 = math.exp %10 : vector<4x2x128xf32>
    %cst_8 = arith.constant dense<0.000000e+00> : vector<2x128xf32>
    %12 = vector.multi_reduction <add>, %11, %cst_8 [0] : vector<4x2x128xf32> to vector<2x128xf32>
    %13 = vector.shape_cast %12 : vector<2x128xf32> to vector<1x2x128xf32>
    %14 = vector.broadcast %13 : vector<1x2x128xf32> to vector<4x2x128xf32>
    %15 = arith.divf %11, %14 : vector<4x2x128xf32>
    %16 = arith.mulf %15, %15 : vector<4x2x128xf32>
    %17 = arith.mulf %6, %6 : vector<4x2x128xf32>
    %18 = arith.mulf %15, %6 : vector<4x2x128xf32>
    %19 = arith.addf %16, %17 : vector<4x2x128xf32>
    %c0_9 = arith.constant 0 : index
    %c0_10 = arith.constant 0 : index
    %c0_11 = arith.constant 0 : index
    %c0_12 = arith.constant 0 : index
    %20 = vector.load %arg5[%c0_9, %c0_10, %c0_11, %c0_12] : memref<1x1x4x128xf32, #tpu.memory_space<vmem>>, vector<1x1x4x128xf32>
    %21 = vector.shape_cast %20 : vector<1x1x4x128xf32> to vector<4x128xf32>
    %cst_13 = arith.constant dense<0.000000e+00> : vector<4x128xf32>
    %22 = vector.multi_reduction <add>, %18, %cst_13 [1] : vector<4x2x128xf32> to vector<4x128xf32>
    %23 = arith.addf %21, %22 : vector<4x128xf32>
    %c0_14 = arith.constant 0 : index
    %c0_15 = arith.constant 0 : index
    %c0_16 = arith.constant 0 : index
    %c0_17 = arith.constant 0 : index
    %24 = vector.load %arg5[%c0_14, %c0_15, %c0_16, %c0_17] : memref<1x1x4x128xf32, #tpu.memory_space<vmem>>, vector<1x1x4x128xf32>
    %25 = vector.shape_cast %24 : vector<1x1x4x128xf32> to vector<4x128xf32>
    %26 = vector.shape_cast %23 : vector<4x128xf32> to vector<1x1x4x128xf32>
    tpu.vector_store %arg5[%c0_14, %c0_15, %c0_16, %c0_17], %26 {strides = array<i32>} : memref<1x1x4x128xf32, #tpu.memory_space<vmem>>, vector<1x1x4x128xf32>,
    %c0_18 = arith.constant 0 : index
    %c0_19 = arith.constant 0 : index
    %c0_20 = arith.constant 0 : index
    %c0_21 = arith.constant 0 : index
    %27 = vector.load %arg6[%c0_18, %c0_19, %c0_20, %c0_21] : memref<1x1x4x128xf32, #tpu.memory_space<vmem>>, vector<1x1x4x128xf32>
    %28 = vector.shape_cast %27 : vector<1x1x4x128xf32> to vector<4x128xf32>
    %cst_22 = arith.constant dense<0.000000e+00> : vector<4x128xf32>
    %29 = vector.multi_reduction <add>, %19, %cst_22 [1] : vector<4x2x128xf32> to vector<4x128xf32>
    %30 = arith.addf %28, %29 : vector<4x128xf32>
    %c0_23 = arith.constant 0 : index
    %c0_24 = arith.constant 0 : index
    %c0_25 = arith.constant 0 : index
    %c0_26 = arith.constant 0 : index
    %31 = vector.load %arg6[%c0_23, %c0_24, %c0_25, %c0_26] : memref<1x1x4x128xf32, #tpu.memory_space<vmem>>, vector<1x1x4x128xf32>
    %32 = vector.shape_cast %31 : vector<1x1x4x128xf32> to vector<4x128xf32>
    %33 = vector.shape_cast %30 : vector<4x128xf32> to vector<1x1x4x128xf32>
    tpu.vector_store %arg6[%c0_23, %c0_24, %c0_25, %c0_26], %33 {strides = array<i32>} : memref<1x1x4x128xf32, #tpu.memory_space<vmem>>, vector<1x1x4x128xf32>,
    return
  }
  func.func @transform_0(%arg0: i32, %arg1: i32, %arg2: i32) -> (i32, i32, i32, i32) {
    %c1_i32 = arith.constant 1 : i32
    %0 = arith.muli %arg1, %c1_i32 : i32
    %1 = arith.addi %0, %arg2 : i32
    %c0_i32 = arith.constant 0 : i32
    %c0_i32_0 = arith.constant 0 : i32
    %c0_i32_1 = arith.constant 0 : i32
    return %arg0, %c0_i32, %1, %c0_i32_0 : i32, i32, i32, i32
  }
  func.func @transform_1(%arg0: i32, %arg1: i32, %arg2: i32) -> (i32, i32, i32, i32) {
    %c1_i32 = arith.constant 1 : i32
    %0 = arith.muli %arg1, %c1_i32 : i32
    %1 = arith.addi %0, %arg2 : i32
    %c0_i32 = arith.constant 0 : i32
    %c0_i32_0 = arith.constant 0 : i32
    %c0_i32_1 = arith.constant 0 : i32
    return %arg0, %c0_i32, %1, %c0_i32_0 : i32, i32, i32, i32
  }
  func.func @transform_2(%arg0: i32, %arg1: i32, %arg2: i32) -> (i32, i32, i32, i32) {
    %c0_i32 = arith.constant 0 : i32
    %c0_i32_0 = arith.constant 0 : i32
    %c0_i32_1 = arith.constant 0 : i32
    return %arg0, %arg1, %c0_i32, %c0_i32_0 : i32, i32, i32, i32
  }
  func.func @transform_3(%arg0: i32, %arg1: i32, %arg2: i32) -> (i32, i32, i32, i32) {
    %c0_i32 = arith.constant 0 : i32
    %c0_i32_0 = arith.constant 0 : i32
    %c0_i32_1 = arith.constant 0 : i32
    return %arg0, %arg1, %c0_i32, %c0_i32_0 : i32, i32, i32, i32
  }
}

</mosaic_0001>

<bundles_post_ra>
// kernel: tpu_custom_call.1
= control target key start
LH: loop header
LB: loop body
LE: loop exit
PB: predicated region body
PF: predicated region fallthrough
CT: control target
= control target key end

     0   :  { %s1147_s0 = inlined_call_operand.hbm [shape: f32[2,4,2,128], index: 0, kind: input, shape index: {}]   ;;  %s1148_s1 = inlined_call_operand.hbm [shape: f32[2,4,2,128], index: 1, kind: input, shape index: {}]   ;;  %s1149_s2 = inlined_call_operand.hbm [shape: f32[2,1,4,128], index: 2, kind: output, shape index: {0}]   ;;  %s1150_s3 = inlined_call_operand.hbm [shape: f32[2,1,4,128], index: 3, kind: output, shape index: {1}]  }
   0x1   :  { %1151 = sst [smem:[#allocation14_spill]] %s1147_s0 }
   0x2   :  { %9 = vsyncpa [#allocation3], 0 }
   0x3   :  { %11 = vsyncpa [#allocation3 + $0x1], 0 }
   0x4   :  { %12 = vsyncpa [#allocation6], 0 }
   0x5   :  { %14 = vsyncpa [#allocation6 + $0x1], 0 }
   0x6   :  { %15 = vsyncpa [#allocation4], 0 }
   0x7   :  { %17 = vsyncpa [#allocation4 + $0x1], 0 }
   0x8   :  { %18 = vsyncpa [#allocation9], 0 }
   0x9   :  { %20 = vsyncpa [#allocation9 + $0x1], 0  ;;  %s905_s12 = smov 0   ;;  %s907_s13 = smov 0  }
   0xa   :  { %s909_s14 = smov 0   ;;  %s911_s15 = smov 0  }
   0xb   :  { %s913_s16 = smov 0   ;;  %s915_s17 = smov 0  }
   0xc LB: > { %s598_s18 = sadd.s32 4294967295, %s876_s17   ;;  %s599_s19 = sadd.s32 4294967294, %s876_s17   ;;  %s876_s17 = sphi %s915_s17, %s26_s17   ;;  %s872_s16 = sphi %s913_s16, %s1164_s16   ;;  %s868_s15 = sphi %s911_s15, %s1163_s15   ;;  %s864_s14 = sphi %s909_s14, %s1162_s14   ;;  %s860_s13 = sphi %s907_s13, %s1161_s13   ;;  %s856_s12 = sphi %s905_s12, %s1160_s12  }
   0xd   : > { %s45_s20 = sadd.s32 1, %s872_s16  ;;  %s56_s21 = sadd.s32 1, %s864_s14 }
   0xe   : > { %p47_p0 = scmp.ge.s32.totalorder %s45_s20, 2  ;;  %p63_p1 = scmp.ne.s32.totalorder %s864_s14, %s860_s13 }
   0xf   : > { %p64_p2 = scmp.eq.s32.totalorder %s876_s17, 0  ;;  %p69_p3 = scmp.ne.s32.totalorder %s860_s13, %s856_s12 }
  0x10   : > { %s1166_s20 = smov (%p47_p0, %s45_s20), 0  ;;  %p70_p5 = scmp.eq.s32.totalorder %s598_s18, 0 }
  0x11   : > { %p946_p4 = por %p64_p2, %p63_p1  ;;  %s51_s23 = ssub.s32 %s872_s16, %s1166_s20 }
  0x12   : > { %p125_p6 = scmp.eq.s32.totalorder %s598_s18, 1  ;;  %p54_p7 = scmp.eq.s32.totalorder %s51_s23, 0 }
  0x13   : > { %p952_p8 = por %p70_p5, %p69_p3  ;;  %p131_p10 = scmp.eq.s32.totalorder %s599_s19, 1 }
  0x14   : > { %p956_p9 = por %p125_p6, %p63_p1  ;;  %p643_p13 = scmp.lt.s32.totalorder %s876_s17, 2 }
  0x15   : > { %s961_s26 = scalar_select %p54_p7, %s864_s14, %s56_s21  }
  0x16   : > { %p963_p11 = por %p131_p10, %p69_p3  ;;  %s970_s28 = sand.u32 1, %s864_s14  }
  0x17   : > { %s602_s29 = sshll.u32 %s970_s28, 3  ;;  %s619_s30 = sshll.u32 %s872_s16, 7 }
  0x18   : > { %s1156_s0 = sld [smem:[#allocation14_spill]]  ;;  %s183_s7 = scalar_lea.vmem [#allocation2], %s602_s29 }
  0x19   : > { %s192_s8 = sshll.u32 %s183_s7, 4  ;;  %p983_p0 = pnand %p643_p13, %p946_p4  ;;  %s193_s8 = int_to_ptr.vmem [resolvable:$true] %s192_s8 }
  0x1a   : > { %p608_p1 = scmp.ge.s32.totalorder %s876_s17, 1  ;;  %s180_s10 = scalar_lea.sflag [#allocation3], %s970_s28 }
  0x1b   : > { %p708_p2 = pneg %p983_p0  ;;  %s719_s11 = scalar_lea.vmem %s193_s8, 128 }
  0x1c   : > { %p720_p3 = scmp.ne.s32.totalorder %s193_s8, %s719_s11  ;;  %s878_s18 = smov [#allocation2]  }
  0x1d   : > { %s724_s19 = sshll.u32 %s878_s18, 4  ;;  %s725_s19 = int_to_ptr.vmem [resolvable:$false] %s724_s19 }
  0x1e   : > { %s191_s6 = scalar_lea.hbm %s1156_s0, %s619_s30  ;;  %p722_p5 = pnand %p720_p3, %p708_p2 }
  0x1f   : > { %s726_s21 = scalar_lea.vmem %s725_s19, 256  ;;  %p727_p4 = scmp.lt.s32.totalorder %s193_s8, %s725_s19 }
  0x20   : > { %p723_p6 = pneg %p722_p5  ;;  %p728_p7 = scmp.lt.s32.totalorder %s726_s21, %s719_s11 }
  0x22   : > { %p729_p10 = por %p728_p7, %p727_p4 }
  0x24   : > { %p730_p13 = pnand %p729_p10, %p723_p6 }
  0x26   : > { %733 = shalt.err (!%p730_p13)
}
  0x27   : > { %s879_s22 = smov 32   ;;  %s880_s23 = smov 2  }
  0x28   : > { %632 = dma.hbm_to_vmem [thread:$0]  (!%p983_p0), %s191_s6, 128, %s193_s8, %s180_s10, %s879_s22, %s879_s22, %s880_s23  }
  0x29   : > { %p223_p3 = scmp.lt.s32.totalorder %s876_s17, 3  ;;  %s214_s7 = scalar_lea.hbm %s1148_s1, %s619_s30 }
  0x2a   : > { %s206_s18 = scalar_lea.vmem [#allocation5], %s602_s29  ;;  %s203_s21 = scalar_lea.sflag [#allocation6], %s970_s28 }
  0x2b   : > { %p1004_p5 = pnand %p608_p1, %p223_p3  ;;  %s215_s19 = sshll.u32 %s206_s18, 4  ;;  %s216_s19 = int_to_ptr.vmem [resolvable:$true] %s215_s19 }
  0x2c   : > { %s747_s0 = scalar_lea.vmem %s216_s19, 128  ;;  %s881_s6 = smov [#allocation5]  }
  0x2d   : > { %p748_p6 = scmp.ne.s32.totalorder %s216_s19, %s747_s0  ;;  %s752_s8 = sshll.u32 %s881_s6, 4  ;;  %s753_s8 = int_to_ptr.vmem [resolvable:$false] %s752_s8 }
  0x2e   : > { %s754_s30 = scalar_lea.vmem %s753_s8, 256  ;;  %p755_p10 = scmp.lt.s32.totalorder %s216_s19, %s753_s8 }
  0x2f   : > { %p750_p4 = pnand %p748_p6, %p708_p2  ;;  %p756_p1 = scmp.lt.s32.totalorder %s754_s30, %s747_s0 }
  0x31   : > { %p751_p7 = pneg %p750_p4  ;;  %p757_p13 = por %p756_p1, %p755_p10 }
  0x33   : > { %p758_p3 = pnand %p757_p13, %p751_p7 }
  0x35   : > { %761 = shalt.err (!%p758_p3)
}
  0x36   : > { %635 = dma.hbm_to_vmem [thread:$0]  (!%p983_p0), %s214_s7, 128, %s216_s19, %s203_s21, %s879_s22, %s879_s22, %s880_s23  }
  0x37   : > { %227 = sbr.rel (%p1004_p5) target bundleno = 169 (0xa9), region = 28  ;;  %s1019_s28 = sand.u32 (!%p1004_p5), 1, %s860_s13  }
  0x38   : > { %s609_s29 = sshll.u32 (!%p1004_p5), %s1019_s28, 3  ;;  %s230_s10 = scalar_lea.sflag (!%p1004_p5), [#allocation3], %s1019_s28 }
  0x39   : > { %s233_s4 = scalar_lea.vmem (!%p1004_p5), [#allocation2], %s609_s29 }
  0x3c   : > { %839 = dma.done.wait (%p952_p8), %s230_s10, 128  }
  0x3d   : > { %841 = vsyncadd (%p952_p8), %s230_s10, 4294967168  ;;  %s239_s0 = scalar_lea.sflag [#allocation6], %s1019_s28  ;;  %s1028_s9 = scalar_lea.vmem [#allocation5], %s609_s29 }
  0x3e   : > { %843 = dma.done.wait (%p952_p8), %s239_s0, 128  }
  0x3f   : > { %845 = vsyncadd (%p952_p8), %s239_s0, 4294967168  ;;  %s611_s22 = sshll.u32 %s1019_s28, 2  ;;  %v882_v0 = vmov 0.0   ;;  %vm291_vm0 = vcmask 1041408   ;;  %v283_v1 = vld [vmem:[%s233_s4] sm:$0x3] }
  0x40   : > { %s1035_s23 = scalar_lea.vmem [#allocation7], %s611_s22  ;;  %s1038_s5 = scalar_lea.vmem [#allocation8], %s611_s22  ;;  %v284_v2 = vld [vmem:[%s233_s4 + $0x2] sm:$0x3]  ;;  %v285_v3 = vld [vmem:[%s233_s4 + $0x4] sm:$0x3] }
  0x41   : > { %281 = vst [vmem:[%s1035_s23] sm:$0xf] %v882_v0  ;;  %282 = vst [vmem:[%s1038_s5] sm:$0xf] %v882_v0  ;;  %v286_v4 = vld [vmem:[%s233_s4 + $0x6] sm:$0x3]  ;;  %v292_v5 = vsel %vm291_vm0, %v283_v1, -inf  ;;  %v293_v6 = vsel %vm291_vm0, %v284_v2, -inf }
  0x42   : > { %v294_v7 = vsel %vm291_vm0, %v285_v3, -inf  ;;  %v295_v8 = vsel %vm291_vm0, %v286_v4, -inf  ;;  %v296_v9 = vmax.f32 %v292_v5, %v293_v6  ;;  %v287_v31 = vld [vmem:[%s1028_s9] sm:$0x3]  ;;  %v288_v32 = vld [vmem:[%s1028_s9 + $0x2] sm:$0x3] }
  0x43   : > { %v297_v10 = vmax.f32 %v294_v7, %v295_v8  ;;  %v289_v33 = vld [vmem:[%s1028_s9 + $0x4] sm:$0x3]  ;;  %v290_v34 = vld [vmem:[%s1028_s9 + $0x6] sm:$0x3]  ;;  %v327_v40 = vmul.f32 %v287_v31, %v287_v31  ;;  %v328_v41 = vmul.f32 %v288_v32, %v288_v32  ;;  %vm372_vm1 = vcmask 1041409   ;;  %s615_s24 = sshll.u32 %s868_s15, 6 }
  0x44   : > { %v329_v42 = vmul.f32 %v289_v33, %v289_v33  ;;  %v330_v43 = vmul.f32 %v290_v34, %v290_v34  ;;  %vm374_vm2 = vcmask 1042434   ;;  %vm376_vm3 = vcmask 1043459   ;;  %s440_s7 = sshll.u32 %s1035_s23, 4  ;;  %s1072_s19 = scalar_lea.hbm %s1149_s2, %s615_s24  ;;  %s1074_s7 = int_to_ptr.vmem [resolvable:$true] %s440_s7 }
  0x45   : > { %v298_v11 = vmax.f32 %v296_v9, %v297_v10  ;;  %s454_s21 = sshll.u32 %s1038_s5, 4  ;;  %s421_s6 = scalar_lea.sflag [#allocation4], %s1019_s28  ;;  %s455_s21 = int_to_ptr.vmem [resolvable:$true] %s454_s21 }
  0x46   : > { %s762_s8 = scalar_lea.vmem %s1074_s7, 64  ;;  %s883_s30 = smov [#allocation7]  }
  0x47   : > { %v299_v12 = vsub.f32 %v283_v1, %v298_v11  ;;  %v300_v13 = vsub.f32 %v284_v2, %v298_v11  ;;  %v301_v14 = vsub.f32 %v285_v3, %v298_v11  ;;  %v302_v15 = vsub.f32 %v286_v4, %v298_v11  ;;  %p763_p8 = scmp.ne.s32.totalorder %s1074_s7, %s762_s8  ;;  %s766_s29 = sshll.u32 %s883_s30, 4  ;;  %s767_s29 = int_to_ptr.vmem [resolvable:$false] %s766_s29 }
  0x48   : > { %s768_s10 = scalar_lea.vmem %s767_s29, 128  ;;  %p769_p5 = scmp.lt.s32.totalorder %s1074_s7, %s767_s29 }
  0x49   : > { %v303_v16 = vmul.f32 1.442695, %v299_v12  ;;  %v305_v17 = vmul.f32 1.442695, %v300_v13  ;;  %v307_v18 = vmul.f32 1.442695, %v301_v14  ;;  %p764_p0 = pnand %p763_p8, %p956_p9  ;;  %p770_p6 = scmp.lt.s32.totalorder %s768_s10, %s762_s8 }
  0x4a   : > { %v309_v19 = vmul.f32 1.442695, %v302_v15 }
  0x4b   : > { %696 = vpow2.f32 %v303_v16  ;;  %p765_p2 = pneg %p764_p0  ;;  %p771_p4 = por %p770_p6, %p769_p5 }
  0x4c   : > { %698 = vpow2.f32 %v305_v17 }
  0x4d   : > { %700 = vpow2.f32 %v307_v18  ;;  %p772_p7 = pnand %p771_p4, %p765_p2 }
  0x4e   : > { %702 = vpow2.f32 %v309_v19 }
  0x58   : > { %v697_v20 = vpop.eup %696 }
  0x59   : > { %v699_v21 = vpop.eup %698  ;;  %v311_v22 = vsel %vm291_vm0, %v697_v20, 0.0 }
  0x5a   : > { %v701_v23 = vpop.eup %700  ;;  %v312_v24 = vsel %vm291_vm0, %v699_v21, 0.0 }
  0x5b   : > { %v703_v25 = vpop.eup %702  ;;  %v313_v26 = vadd.f32 %v312_v24, %v311_v22  ;;  %v314_v27 = vsel %vm291_vm0, %v701_v23, 0.0 }
  0x5c   : > { %v316_v28 = vsel %vm291_vm0, %v703_v25, 0.0 }
  0x5d   : > { %v315_v29 = vadd.f32 %v314_v27, %v313_v26 }
  0x5f   : > { %v317_v30 = vadd.f32 %v316_v28, %v315_v29 }
  0x61   : > { %704 = vrcp.f32 %v317_v30 }
  0x6e   : > { %v705_v35 = vpop.eup %704 }
  0x6f   : > { %v319_v36 = vmul.f32 %v705_v35, %v697_v20  ;;  %v320_v37 = vmul.f32 %v705_v35, %v699_v21  ;;  %v321_v38 = vmul.f32 %v705_v35, %v701_v23  ;;  %v322_v39 = vmul.f32 %v705_v35, %v703_v25 }
  0x71   : > { %v331_v44 = vmul.f32 %v319_v36, %v287_v31  ;;  %v332_v45 = vmul.f32 %v320_v37, %v288_v32  ;;  %v333_v46 = vmul.f32 %v321_v38, %v289_v33  ;;  %v334_v47 = vmul.f32 %v322_v39, %v290_v34 }
  0x72   : > { %v323_v48 = vmul.f32 %v319_v36, %v319_v36  ;;  %v324_v49 = vmul.f32 %v320_v37, %v320_v37  ;;  %v325_v50 = vmul.f32 %v321_v38, %v321_v38  ;;  %v326_v51 = vmul.f32 %v322_v39, %v322_v39 }
  0x73   : > { %v340_v52 = vsel %vm291_vm0, %v331_v44, 0.0  ;;  %v347_v53 = vsel %vm291_vm0, %v332_v45, 0.0  ;;  %v354_v54 = vsel %vm291_vm0, %v333_v46, 0.0  ;;  %v361_v55 = vsel %vm291_vm0, %v334_v47, 0.0 }
  0x74   : > { %v341_v56 = vrot.slane %v340_v52, 4  ;;  %v348_v57 = vrot.slane %v347_v53, 4  ;;  %v355_v58 = vrot.slane %v354_v54, 4  ;;  %v362_v59 = vrot.slane %v361_v55, 4 }
  0x75   : > { %v335_v60 = vadd.f32 %v327_v40, %v323_v48  ;;  %v336_v61 = vadd.f32 %v328_v41, %v324_v49  ;;  %v337_v62 = vadd.f32 %v329_v42, %v325_v50  ;;  %v338_v63 = vadd.f32 %v330_v43, %v326_v51  ;;  %v339_v40 = vld [vmem:[%s1035_s23] sm:$0xf] }
  0x76   : > { %v342_v0 = vadd.f32 %v341_v56, %v340_v52  ;;  %v349_v1 = vadd.f32 %v348_v57, %v347_v53  ;;  %v356_v2 = vadd.f32 %v355_v58, %v354_v54  ;;  %v363_v3 = vadd.f32 %v362_v59, %v361_v55  ;;  %v381_v53 = vld [vmem:[%s1038_s5] sm:$0xf] }
  0x77   : > { %v382_v4 = vsel %vm291_vm0, %v335_v60, 0.0  ;;  %v389_v5 = vsel %vm291_vm0, %v336_v61, 0.0  ;;  %v396_v6 = vsel %vm291_vm0, %v337_v62, 0.0  ;;  %v403_v7 = vsel %vm291_vm0, %v338_v63, 0.0 }
  0x78   : > { %v343_v8 = vrot.slane %v342_v0, 2  ;;  %v350_v9 = vrot.slane %v349_v1, 2  ;;  %v357_v10 = vrot.slane %v356_v2, 2  ;;  %v364_v11 = vrot.slane %v363_v3, 2 }
  0x79   : > { %v383_v12 = vrot.slane %v382_v4, 4  ;;  %v390_v13 = vrot.slane %v389_v5, 4  ;;  %v397_v14 = vrot.slane %v396_v6, 4  ;;  %v404_v15 = vrot.slane %v403_v7, 4 }
  0x7a   : > { %v344_v16 = vadd.f32 %v343_v8, %v342_v0  ;;  %v351_v17 = vadd.f32 %v350_v9, %v349_v1  ;;  %v358_v18 = vadd.f32 %v357_v10, %v356_v2  ;;  %v365_v19 = vadd.f32 %v364_v11, %v363_v3 }
  0x7b   : > { %v384_v20 = vadd.f32 %v383_v12, %v382_v4  ;;  %v391_v21 = vadd.f32 %v390_v13, %v389_v5  ;;  %v398_v22 = vadd.f32 %v397_v14, %v396_v6  ;;  %v405_v23 = vadd.f32 %v404_v15, %v403_v7 }
  0x7c   : > { %v345_v24 = vrot.slane %v344_v16, 1  ;;  %v352_v25 = vrot.slane %v351_v17, 1  ;;  %v359_v26 = vrot.slane %v358_v18, 1  ;;  %v366_v27 = vrot.slane %v365_v19, 1 }
  0x7d   : > { %v385_v28 = vrot.slane %v384_v20, 2  ;;  %v392_v29 = vrot.slane %v391_v21, 2  ;;  %v399_v30 = vrot.slane %v398_v22, 2  ;;  %v406_v31 = vrot.slane %v405_v23, 2 }
  0x7e   : > { %v346_v32 = vadd.f32 %v345_v24, %v344_v16  ;;  %v353_v33 = vadd.f32 %v352_v25, %v351_v17  ;;  %v360_v34 = vadd.f32 %v359_v26, %v358_v18  ;;  %v367_v35 = vadd.f32 %v366_v27, %v365_v19 }
  0x7f   : > { %v386_v36 = vadd.f32 %v385_v28, %v384_v20  ;;  %v393_v37 = vadd.f32 %v392_v29, %v391_v21  ;;  %v400_v38 = vadd.f32 %v399_v30, %v398_v22  ;;  %v407_v39 = vadd.f32 %v406_v31, %v405_v23 }
  0x80   : > { %v373_v41 = vsel %vm372_vm1, %v353_v33, %v346_v32 }
  0x81   : > { %v375_v42 = vsel %vm374_vm2, %v360_v34, %v373_v41  ;;  %v387_v43 = vrot.slane %v386_v36, 1  ;;  %v394_v44 = vrot.slane %v393_v37, 1  ;;  %v401_v45 = vrot.slane %v400_v38, 1 }
  0x82   : > { %v377_v46 = vsel %vm376_vm3, %v367_v35, %v375_v42  ;;  %v408_v47 = vrot.slane %v407_v39, 1 }
  0x83   : > { %v379_v48 = vadd.f32 %v377_v46, %v339_v40  ;;  %v388_v49 = vadd.f32 %v387_v43, %v386_v36  ;;  %v395_v50 = vadd.f32 %v394_v44, %v393_v37  ;;  %v402_v51 = vadd.f32 %v401_v45, %v400_v38 }
  0x84   : > { %v409_v52 = vadd.f32 %v408_v47, %v407_v39 }
  0x85   : > { %380 = vst [vmem:[%s1035_s23] sm:$0xf] %v379_v48  ;;  %v414_v54 = vsel %vm372_vm1, %v395_v50, %v388_v49 }
  0x86   : > { %v415_v55 = vsel %vm374_vm2, %v402_v51, %v414_v54 }
  0x87   : > { %775 = shalt.err (!%p772_p7)
}
  0x88   : > { %s776_s4 = scalar_lea.hbm %s1072_s19, 64  ;;  %s780_s22 = scalar_lea.hbm %s1149_s2, 128 }
  0x89   : > { %p777_p10 = scmp.ne.s32.totalorder %s1072_s19, %s776_s4  ;;  %p781_p3 = scmp.lt.s32.totalorder %s1072_s19, %s1149_s2 }
  0x8a   : > { %p782_p8 = scmp.lt.s32.totalorder %s780_s22, %s776_s4 }
  0x8b   : > { %p778_p1 = pnand %p777_p10, %p956_p9 }
  0x8c   : > { %p783_p0 = por %p782_p8, %p781_p3 }
  0x8d   : > { %p779_p13 = pneg %p778_p1 }
  0x8f   : > { %p784_p2 = pnand %p783_p0, %p779_p13 }
  0x91   : > { %787 = shalt.err (!%p784_p2)
}
  0x92   : > { %625 = dma.vmem_to_hbm [thread:$0]  (%p956_p9), %s1074_s7, 64, %s1072_s19, %s421_s6   ;;  %v416_v56 = vsel %vm376_vm3, %v409_v52, %v415_v55 }
  0x93   : > { %v418_v57 = vadd.f32 %v416_v56, %v381_v53  ;;  %s452_s30 = scalar_lea.hbm %s1150_s3, %s615_s24  ;;  %s426_s29 = scalar_lea.sflag [#allocation9], %s1019_s28 }
  0x94   : > { %s788_s10 = scalar_lea.vmem %s455_s21, 64  ;;  %s884_s4 = smov [#allocation8]  }
  0x95   : > { %419 = vst [vmem:[%s1038_s5] sm:$0xf] %v418_v57  ;;  %p789_p5 = scmp.ne.s32.totalorder %s455_s21, %s788_s10  ;;  %s792_s0 = sshll.u32 %s884_s4, 4  ;;  %s793_s0 = int_to_ptr.vmem [resolvable:$false] %s792_s0 }
  0x96   : > { %s794_s7 = scalar_lea.vmem %s793_s0, 128  ;;  %p795_p7 = scmp.lt.s32.totalorder %s455_s21, %s793_s0 }
  0x97   : > { %p790_p6 = pnand %p789_p5, %p956_p9  ;;  %p796_p10 = scmp.lt.s32.totalorder %s794_s7, %s788_s10 }
  0x99   : > { %p791_p4 = pneg %p790_p6  ;;  %p797_p1 = por %p796_p10, %p795_p7 }
  0x9b   : > { %p798_p13 = pnand %p797_p1, %p791_p4 }
  0x9d   : > { %801 = shalt.err (!%p798_p13)
}
  0x9e   : > { %s802_s15 = scalar_lea.hbm %s452_s30, 64  ;;  %s806_s24 = scalar_lea.hbm %s1150_s3, 128 }
  0x9f   : > { %p803_p3 = scmp.ne.s32.totalorder %s452_s30, %s802_s15  ;;  %p807_p2 = scmp.lt.s32.totalorder %s452_s30, %s1150_s3 }
  0xa0   : > { %p808_p5 = scmp.lt.s32.totalorder %s806_s24, %s802_s15 }
  0xa1   : > { %p804_p8 = pnand %p803_p3, %p956_p9 }
  0xa2   : > { %p809_p6 = por %p808_p5, %p807_p2 }
  0xa3   : > { %p805_p0 = pneg %p804_p8 }
  0xa5   : > { %p810_p12 = pnand %p809_p6, %p805_p0 }
  0xa7   : > { %813 = shalt.err (!%p810_p12)
}
  0xa8   : > { %626 = dma.vmem_to_hbm [thread:$0]  (%p956_p9), %s455_s21, 64, %s452_s30, %s426_s29  }
  0xa9 PF: > { %s466_s9 = sand.u32 1, %s856_s12   ;;  %p1159_p4 = scmp.ge.s32.totalorder %s876_s17, 2 }
  0xaa   : > { %s467_s22 = scalar_lea.sflag [#allocation4], %s466_s9 }
  0xab   : > { %p637_p7 = pnand %p1159_p4, %p963_p11 }
  0xad   : > { %p638_p10 = pneg %p637_p7 }
  0xaf   : > { %847 = dma.done.wait (%p638_p10), %s467_s22, 64  }
  0xb0   : > { %849 = vsyncadd (%p638_p10), %s467_s22, 4294967232  ;;  %s476_s23 = scalar_lea.sflag [#allocation9], %s466_s9 }
  0xb1   : > { %851 = dma.done.wait (%p638_p10), %s476_s23, 64  }
  0xb2   : > { %853 = vsyncadd (%p638_p10), %s476_s23, 4294967232  ;;  %s26_s17 = sadd.s32 1, %s876_s17   ;;  %s1160_s12 = smov %s860_s13 }
  0xb3   : > { %p23_p12 = scmp.ge.s32.totalorder %s26_s17, 4   ;;  %s1161_s13 = smov %s864_s14 }
  0xb4   : > { %s1162_s14 = smov %s961_s26  ;;  %s1163_s15 = smov %s872_s16 }
  0xb5   : > { %s1164_s16 = smov %s1166_s20  ;;  %25 = sbr.rel (!%p23_p12) target bundleno = 12 (0xc), region = 107 }
  0xba   :  { %481 = vsyncpa [#allocation3], 1 }
  0xbb   :  { %483 = vsyncpa [#allocation3 + $0x1], 1 }
  0xbc   :  { %484 = vsyncpa [#allocation6], 1 }
  0xbd   :  { %486 = vsyncpa [#allocation6 + $0x1], 1 }
  0xbe   :  { %487 = vsyncpa [#allocation4], 1 }
  0xbf   :  { %489 = vsyncpa [#allocation4 + $0x1], 1 }
  0xc0   :  { %490 = vsyncpa [#allocation9], 1 }
  0xc1   :  { %492 = vsyncpa [#allocation9 + $0x1], 1 }

</bundles_post_ra>
